<compile_context>
chip_gen: v7x
topology: tpu7x:2x2x1
jax: 0.10.0
libtpu: 0.0.40
codegen_flags: <defaults>
</compile_context>

<pallas_src>
import functools

import numpy as np
import jax
import jax.numpy as jnp
from jax.experimental import pallas as pl
from jax.experimental.pallas import tpu as pltpu

_LANE = 128  # TPU lane width; lane axis carries (row-group, channel) pairs.


def _build_spatial_kernel(window_size: int, sigma_xy2: float) -> np.ndarray:
    """Same construction as BilateralFilter._build_spatial_kernel (flattened)."""
    pad = window_size // 2
    xv, yv = np.meshgrid(range(-pad, pad + 1), range(-pad, pad + 1))
    dist2 = (xv ** 2 + yv ** 2).ravel().astype(np.float32)
    return np.exp(-0.5 * dist2 / sigma_xy2)  # (L,), l = dy*Wsize + dx


def _make_bilateral_kernel(hg, w, window_size, sigma_z2, spatial_w, wt):
    pad = window_size // 2
    neg_half_inv = -0.5 / float(sigma_z2)
    n_full = w // wt
    rem = w - n_full * wt

    def kernel(xg_ref, out_ref):
        # xg_ref : (hg + 2*pad, w + 2*pad, 128) zero-padded row-group slab
        # out_ref: (hg, w, 128)
        def do_tile(y, c0, width):
            # Center tap: spatial weight == 1, diff == 0 -> skip exp chain.
            center = xg_ref[pl.ds(y + pad, 1), pl.ds(c0 + pad, width), :]
            num = center
            den = jnp.ones_like(center)
            # Static unroll over the remaining L-1 window offsets.
            # dy -> leading-dim offset, dx -> sublane offset: no lane rotation.
            for dy in range(window_size):
                for dx in range(window_size):
                    if dy == pad and dx == pad:
                        continue
                    sw = float(spatial_w[dy * window_size + dx])
                    shifted = xg_ref[pl.ds(y + dy, 1), pl.ds(c0 + dx, width), :]
                    diff = shifted - center
                    wgt = jnp.exp((diff * diff) * neg_half_inv) * sw
                    num = num + wgt * shifted
                    den = den + wgt
            out_ref[pl.ds(y, 1), pl.ds(c0, width), :] = num / den

        def row_body(y, carry):
            if n_full == 1 and rem == 0:
                # Single column tile (W <= 64): the common / test-case path.
                do_tile(y, 0, wt)
            else:
                def col_body(t, cc):
                    do_tile(y, pl.multiple_of(t * wt, wt), wt)
                    return cc
                jax.lax.fori_loop(0, n_full, col_body, 0)
                if rem:
                    do_tile(y, n_full * wt, rem)
            return carry

        # Unroll adjacent rows so independent exp chains interleave on the EUP.
        jax.lax.fori_loop(0, hg, row_body, 0,
                          unroll=(True if hg <= 4 else 2))

    return kernel


@functools.partial(jax.jit, static_argnames=("window_size", "sigma_xy", "sigma_z"))
def bilateral_filter(x, *, window_size=5, sigma_xy=1.0, sigma_z=1.0):
    """x: (N, C, H, W) float32  ->  (N, C, H, W) float32."""
    n, c, h, w = x.shape
    pad = window_size // 2
    wp = w + 2 * pad
    nc = n * c

    sigma_xy2 = float(sigma_xy) ** 2
    sigma_z2 = float(sigma_z) ** 2
    spatial_w = _build_spatial_kernel(window_size, sigma_xy2)

    # ---- choose rows-per-group (hg) ----------------------------------------
    # VMEM budget per grid step (double-buffered in + out) <= ~16 MiB:
    #   2 * ((hg + 2*pad)*wp + hg*w) * 128 lanes * 4 B  <=  16 MiB
    budget_elems = (16 * 1024 * 1024) // (2 * _LANE * 4)
    hg_vmem_max = max(1, (budget_elems - 2 * pad * wp) // (wp + w))

    if nc >= _LANE:
        tgt_groups = 1                         # channels alone fill the lanes
    else:
        tgt_groups = -(-_LANE // nc)           # fill one 128-lane block
        if h >= 2 * tgt_groups * 8:            # afford 2 blocks (megacore) with hg>=8
            tgt_groups *= 2
    hg = max(1, min(h // tgt_groups, hg_vmem_max))   # rows per group
    g = -(-h // hg)                                  # number of row groups
    hgp = hg + 2 * pad

    lanes = g * nc
    lanes_p = -(-lanes // _LANE) * _LANE
    n_blocks = lanes_p // _LANE

    # Column tile for the in-kernel inner loop (keeps vreg pressure bounded).
    wt = w if w <= 64 else 64

    # ---- layout plumbing ----------------------------------------------------
    # NCHW -> (H, W, N*C), zero-pad spatially (nn.Unfold semantics) and pad H
    # up to g*hg rows, then gather overlapping (hg + 2*pad)-row windows and
    # fold the group index into the lane axis: (hgp, Wp, g*nc).
    xf = x.astype(jnp.float32)
    xhwc = jnp.transpose(xf, (2, 3, 0, 1)).reshape(h, w, nc)
    extra_rows = g * hg - h
    xp = jnp.pad(xhwc, ((pad, pad + extra_rows), (pad, pad), (0, 0)))
    row_idx = (jnp.arange(g)[:, None] * hg
               + jnp.arange(hgp)[None, :]).reshape(-1)
    xg = jnp.take(xp, row_idx, axis=0)                    # (g*hgp, Wp, nc)
    xg = xg.reshape(g, hgp, wp, nc)
    xg = jnp.transpose(xg, (1, 2, 0, 3)).reshape(hgp, wp, g * nc)
    if lanes_p != g * nc:
        xg = jnp.pad(xg, ((0, 0), (0, 0), (0, lanes_p - g * nc)))

    kernel = _make_bilateral_kernel(hg, w, window_size, sigma_z2, spatial_w, wt)

    out = pl.pallas_call(
        kernel,
        out_shape=jax.ShapeDtypeStruct((hg, w, lanes_p), jnp.float32),
        grid_spec=pltpu.PrefetchScalarGridSpec(
            num_scalar_prefetch=0,
            grid=(n_blocks,),
            in_specs=[pl.BlockSpec((hgp, wp, _LANE), lambda i: (0, 0, i))],
            out_specs=pl.BlockSpec((hg, w, _LANE), lambda i: (0, 0, i)),
        ),
        compiler_params=pltpu.CompilerParams(
            dimension_semantics=("parallel",),
            vmem_limit_bytes=32 * 1024 * 1024),
    )(xg)

    # Unpack: lanes -> (group, channel), groups -> rows, drop padded rows.
    out = out[:, :, :g * nc].reshape(hg, w, g, nc)
    out = jnp.transpose(out, (2, 0, 1, 3)).reshape(g * hg, w, nc)
    out = out[:h].reshape(h, w, n, c)
    return jnp.transpose(out, (2, 3, 0, 1))


def bilateral_filter_ref(x, *, window_size=5, sigma_xy=1.0, sigma_z=1.0):
    """Pure-JAX reference mirroring the PyTorch forward (unfold-based)."""
    n, c, h, w = x.shape
    pad = window_size // 2
    sigma_xy2 = float(sigma_xy) ** 2
    sigma_z2 = float(sigma_z) ** 2
    spatial_w = jnp.asarray(
        _build_spatial_kernel(window_size, sigma_xy2)).reshape(1, 1, -1, 1)

    xp = jnp.pad(x, ((0, 0), (0, 0), (pad, pad), (pad, pad)))
    patches = []
    for dy in range(window_size):
        for dx in range(window_size):
            patches.append(xp[:, :, dy:dy + h, dx:dx + w].reshape(n, c, 1, h * w))
    un_x = jnp.concatenate(patches, axis=2)            # (n, c, L, H*W)
    center = x.reshape(n, c, 1, h * w)
    sim_z = jnp.exp(-0.5 * (un_x - center) ** 2 / sigma_z2)
    sim = sim_z * spatial_w
    out = (sim * un_x).sum(axis=2) / sim.sum(axis=2)
    return out.reshape(n, c, h, w)


if __name__ == "__main__":
    key = jax.random.PRNGKey(0)
    x = jax.random.normal(key, (2, 4, 16, 16), dtype=jnp.float32)

    out = bilateral_filter(x, window_size=5, sigma_xy=1.0, sigma_z=1.0)
    out = jax.block_until_ready(out)

    ref = bilateral_filter_ref(x, window_size=5, sigma_xy=1.0, sigma_z=1.0)
    assert out.shape == (2, 4, 16, 16)
    np.testing.assert_allclose(np.asarray(out), np.asarray(ref),
                               rtol=1e-5, atol=1e-5)
    print("KERNEL_OK")
</pallas_src>

<mosaic_0001>
module attributes {stable_mosaic.version = 11 : i64} {
  func.func @kernel(%arg0: i32, %arg1: memref<5x20x128xf32, #tpu.memory_space<vmem>>, %arg2: memref<1x16x128xf32, #tpu.memory_space<vmem>>) attributes {dimension_semantics = [#tpu.dimension_semantics<parallel>], iteration_bounds = array<i64: 1>, scalar_prefetch = 0 : i64, scratch_operands = 0 : i64, tpu.core_type = #tpu.core_type<tc>, window_params = [{transform_indices = @transform_0, window_bounds = array<i64: 5, 20, 128>}, {transform_indices = @transform_1, window_bounds = array<i64: 1, 16, 128>}]} {
    %c0_i32 = arith.constant 0 : i32
    %c2_i32 = arith.constant 2 : i32
    %0 = arith.addi %c0_i32, %c2_i32 : i32
    %1 = arith.index_cast %0 : i32 to index
    %c2 = arith.constant 2 : index
    %c0 = arith.constant 0 : index
    %2 = vector.load %arg1[%1, %c2, %c0] : memref<5x20x128xf32, #tpu.memory_space<vmem>>, vector<1x16x128xf32>
    %cst = arith.constant 1.000000e+00 : f32
    %3 = vector.broadcast %cst : f32 to vector<1x16x128xf32>
    %c0_i32_0 = arith.constant 0 : i32
    %4 = arith.addi %c0_i32, %c0_i32_0 : i32
    %5 = arith.index_cast %4 : i32 to index
    %c0_1 = arith.constant 0 : index
    %c0_2 = arith.constant 0 : index
    %6 = vector.load %arg1[%5, %c0_1, %c0_2] : memref<5x20x128xf32, #tpu.memory_space<vmem>>, vector<1x16x128xf32>
    %7 = arith.subf %6, %2 : vector<1x16x128xf32>
    %8 = arith.mulf %7, %7 : vector<1x16x128xf32>
    %cst_3 = arith.constant -5.000000e-01 : f32
    %9 = vector.broadcast %cst_3 : f32 to vector<1x16x128xf32>
    %10 = arith.mulf %8, %9 : vector<1x16x128xf32>
    %11 = math.exp %10 : vector<1x16x128xf32>
    %cst_4 = arith.constant 0.0183156393 : f32
    %12 = vector.broadcast %cst_4 : f32 to vector<1x16x128xf32>
    %13 = arith.mulf %11, %12 : vector<1x16x128xf32>
    %14 = arith.mulf %13, %6 : vector<1x16x128xf32>
    %15 = arith.addf %2, %14 : vector<1x16x128xf32>
    %16 = arith.addf %3, %13 : vector<1x16x128xf32>
    %c0_i32_5 = arith.constant 0 : i32
    %17 = arith.addi %c0_i32, %c0_i32_5 : i32
    %18 = arith.index_cast %17 : i32 to index
    %c1 = arith.constant 1 : index
    %c0_6 = arith.constant 0 : index
    %19 = vector.load %arg1[%18, %c1, %c0_6] : memref<5x20x128xf32, #tpu.memory_space<vmem>>, vector<1x16x128xf32>
    %20 = arith.subf %19, %2 : vector<1x16x128xf32>
    %21 = arith.mulf %20, %20 : vector<1x16x128xf32>
    %cst_7 = arith.constant -5.000000e-01 : f32
    %22 = vector.broadcast %cst_7 : f32 to vector<1x16x128xf32>
    %23 = arith.mulf %21, %22 : vector<1x16x128xf32>
    %24 = math.exp %23 : vector<1x16x128xf32>
    %cst_8 = arith.constant 0.0820850059 : f32
    %25 = vector.broadcast %cst_8 : f32 to vector<1x16x128xf32>
    %26 = arith.mulf %24, %25 : vector<1x16x128xf32>
    %27 = arith.mulf %26, %19 : vector<1x16x128xf32>
    %28 = arith.addf %15, %27 : vector<1x16x128xf32>
    %29 = arith.addf %16, %26 : vector<1x16x128xf32>
    %c0_i32_9 = arith.constant 0 : i32
    %30 = arith.addi %c0_i32, %c0_i32_9 : i32
    %31 = arith.index_cast %30 : i32 to index
    %c2_10 = arith.constant 2 : index
    %c0_11 = arith.constant 0 : index
    %32 = vector.load %arg1[%31, %c2_10, %c0_11] : memref<5x20x128xf32, #tpu.memory_space<vmem>>, vector<1x16x128xf32>
    %33 = arith.subf %32, %2 : vector<1x16x128xf32>
    %34 = arith.mulf %33, %33 : vector<1x16x128xf32>
    %cst_12 = arith.constant -5.000000e-01 : f32
    %35 = vector.broadcast %cst_12 : f32 to vector<1x16x128xf32>
    %36 = arith.mulf %34, %35 : vector<1x16x128xf32>
    %37 = math.exp %36 : vector<1x16x128xf32>
    %cst_13 = arith.constant 0.135335281 : f32
    %38 = vector.broadcast %cst_13 : f32 to vector<1x16x128xf32>
    %39 = arith.mulf %37, %38 : vector<1x16x128xf32>
    %40 = arith.mulf %39, %32 : vector<1x16x128xf32>
    %41 = arith.addf %28, %40 : vector<1x16x128xf32>
    %42 = arith.addf %29, %39 : vector<1x16x128xf32>
    %c0_i32_14 = arith.constant 0 : i32
    %43 = arith.addi %c0_i32, %c0_i32_14 : i32
    %44 = arith.index_cast %43 : i32 to index
    %c3 = arith.constant 3 : index
    %c0_15 = arith.constant 0 : index
    %45 = vector.load %arg1[%44, %c3, %c0_15] : memref<5x20x128xf32, #tpu.memory_space<vmem>>, vector<1x16x128xf32>
    %46 = arith.subf %45, %2 : vector<1x16x128xf32>
    %47 = arith.mulf %46, %46 : vector<1x16x128xf32>
    %cst_16 = arith.constant -5.000000e-01 : f32
    %48 = vector.broadcast %cst_16 : f32 to vector<1x16x128xf32>
    %49 = arith.mulf %47, %48 : vector<1x16x128xf32>
    %50 = math.exp %49 : vector<1x16x128xf32>
    %cst_17 = arith.constant 0.0820850059 : f32
    %51 = vector.broadcast %cst_17 : f32 to vector<1x16x128xf32>
    %52 = arith.mulf %50, %51 : vector<1x16x128xf32>
    %53 = arith.mulf %52, %45 : vector<1x16x128xf32>
    %54 = arith.addf %41, %53 : vector<1x16x128xf32>
    %55 = arith.addf %42, %52 : vector<1x16x128xf32>
    %c0_i32_18 = arith.constant 0 : i32
    %56 = arith.addi %c0_i32, %c0_i32_18 : i32
    %57 = arith.index_cast %56 : i32 to index
    %c4 = arith.constant 4 : index
    %c0_19 = arith.constant 0 : index
    %58 = vector.load %arg1[%57, %c4, %c0_19] : memref<5x20x128xf32, #tpu.memory_space<vmem>>, vector<1x16x128xf32>
    %59 = arith.subf %58, %2 : vector<1x16x128xf32>
    %60 = arith.mulf %59, %59 : vector<1x16x128xf32>
    %cst_20 = arith.constant -5.000000e-01 : f32
    %61 = vector.broadcast %cst_20 : f32 to vector<1x16x128xf32>
    %62 = arith.mulf %60, %61 : vector<1x16x128xf32>
    %63 = math.exp %62 : vector<1x16x128xf32>
    %cst_21 = arith.constant 0.0183156393 : f32
    %64 = vector.broadcast %cst_21 : f32 to vector<1x16x128xf32>
    %65 = arith.mulf %63, %64 : vector<1x16x128xf32>
    %66 = arith.mulf %65, %58 : vector<1x16x128xf32>
    %67 = arith.addf %54, %66 : vector<1x16x128xf32>
    %68 = arith.addf %55, %65 : vector<1x16x128xf32>
    %c1_i32 = arith.constant 1 : i32
    %69 = arith.addi %c0_i32, %c1_i32 : i32
    %70 = arith.index_cast %69 : i32 to index
    %c0_22 = arith.constant 0 : index
    %c0_23 = arith.constant 0 : index
    %71 = vector.load %arg1[%70, %c0_22, %c0_23] : memref<5x20x128xf32, #tpu.memory_space<vmem>>, vector<1x16x128xf32>
    %72 = arith.subf %71, %2 : vector<1x16x128xf32>
    %73 = arith.mulf %72, %72 : vector<1x16x128xf32>
    %cst_24 = arith.constant -5.000000e-01 : f32
    %74 = vector.broadcast %cst_24 : f32 to vector<1x16x128xf32>
    %75 = arith.mulf %73, %74 : vector<1x16x128xf32>
    %76 = math.exp %75 : vector<1x16x128xf32>
    %cst_25 = arith.constant 0.0820850059 : f32
    %77 = vector.broadcast %cst_25 : f32 to vector<1x16x128xf32>
    %78 = arith.mulf %76, %77 : vector<1x16x128xf32>
    %79 = arith.mulf %78, %71 : vector<1x16x128xf32>
    %80 = arith.addf %67, %79 : vector<1x16x128xf32>
    %81 = arith.addf %68, %78 : vector<1x16x128xf32>
    %c1_i32_26 = arith.constant 1 : i32
    %82 = arith.addi %c0_i32, %c1_i32_26 : i32
    %83 = arith.index_cast %82 : i32 to index
    %c1_27 = arith.constant 1 : index
    %c0_28 = arith.constant 0 : index
    %84 = vector.load %arg1[%83, %c1_27, %c0_28] : memref<5x20x128xf32, #tpu.memory_space<vmem>>, vector<1x16x128xf32>
    %85 = arith.subf %84, %2 : vector<1x16x128xf32>
    %86 = arith.mulf %85, %85 : vector<1x16x128xf32>
    %cst_29 = arith.constant -5.000000e-01 : f32
    %87 = vector.broadcast %cst_29 : f32 to vector<1x16x128xf32>
    %88 = arith.mulf %86, %87 : vector<1x16x128xf32>
    %89 = math.exp %88 : vector<1x16x128xf32>
    %cst_30 = arith.constant 0.367879421 : f32
    %90 = vector.broadcast %cst_30 : f32 to vector<1x16x128xf32>
    %91 = arith.mulf %89, %90 : vector<1x16x128xf32>
    %92 = arith.mulf %91, %84 : vector<1x16x128xf32>
    %93 = arith.addf %80, %92 : vector<1x16x128xf32>
    %94 = arith.addf %81, %91 : vector<1x16x128xf32>
    %c1_i32_31 = arith.constant 1 : i32
    %95 = arith.addi %c0_i32, %c1_i32_31 : i32
    %96 = arith.index_cast %95 : i32 to index
    %c2_32 = arith.constant 2 : index
    %c0_33 = arith.constant 0 : index
    %97 = vector.load %arg1[%96, %c2_32, %c0_33] : memref<5x20x128xf32, #tpu.memory_space<vmem>>, vector<1x16x128xf32>
    %98 = arith.subf %97, %2 : vector<1x16x128xf32>
    %99 = arith.mulf %98, %98 : vector<1x16x128xf32>
    %cst_34 = arith.constant -5.000000e-01 : f32
    %100 = vector.broadcast %cst_34 : f32 to vector<1x16x128xf32>
    %101 = arith.mulf %99, %100 : vector<1x16x128xf32>
    %102 = math.exp %101 : vector<1x16x128xf32>
    %cst_35 = arith.constant 0.606530666 : f32
    %103 = vector.broadcast %cst_35 : f32 to vector<1x16x128xf32>
    %104 = arith.mulf %102, %103 : vector<1x16x128xf32>
    %105 = arith.mulf %104, %97 : vector<1x16x128xf32>
    %106 = arith.addf %93, %105 : vector<1x16x128xf32>
    %107 = arith.addf %94, %104 : vector<1x16x128xf32>
    %c1_i32_36 = arith.constant 1 : i32
    %108 = arith.addi %c0_i32, %c1_i32_36 : i32
    %109 = arith.index_cast %108 : i32 to index
    %c3_37 = arith.constant 3 : index
    %c0_38 = arith.constant 0 : index
    %110 = vector.load %arg1[%109, %c3_37, %c0_38] : memref<5x20x128xf32, #tpu.memory_space<vmem>>, vector<1x16x128xf32>
    %111 = arith.subf %110, %2 : vector<1x16x128xf32>
    %112 = arith.mulf %111, %111 : vector<1x16x128xf32>
    %cst_39 = arith.constant -5.000000e-01 : f32
    %113 = vector.broadcast %cst_39 : f32 to vector<1x16x128xf32>
    %114 = arith.mulf %112, %113 : vector<1x16x128xf32>
    %115 = math.exp %114 : vector<1x16x128xf32>
    %cst_40 = arith.constant 0.367879421 : f32
    %116 = vector.broadcast %cst_40 : f32 to vector<1x16x128xf32>
    %117 = arith.mulf %115, %116 : vector<1x16x128xf32>
    %118 = arith.mulf %117, %110 : vector<1x16x128xf32>
    %119 = arith.addf %106, %118 : vector<1x16x128xf32>
    %120 = arith.addf %107, %117 : vector<1x16x128xf32>
    %c1_i32_41 = arith.constant 1 : i32
    %121 = arith.addi %c0_i32, %c1_i32_41 : i32
    %122 = arith.index_cast %121 : i32 to index
    %c4_42 = arith.constant 4 : index
    %c0_43 = arith.constant 0 : index
    %123 = vector.load %arg1[%122, %c4_42, %c0_43] : memref<5x20x128xf32, #tpu.memory_space<vmem>>, vector<1x16x128xf32>
    %124 = arith.subf %123, %2 : vector<1x16x128xf32>
    %125 = arith.mulf %124, %124 : vector<1x16x128xf32>
    %cst_44 = arith.constant -5.000000e-01 : f32
    %126 = vector.broadcast %cst_44 : f32 to vector<1x16x128xf32>
    %127 = arith.mulf %125, %126 : vector<1x16x128xf32>
    %128 = math.exp %127 : vector<1x16x128xf32>
    %cst_45 = arith.constant 0.0820850059 : f32
    %129 = vector.broadcast %cst_45 : f32 to vector<1x16x128xf32>
    %130 = arith.mulf %128, %129 : vector<1x16x128xf32>
    %131 = arith.mulf %130, %123 : vector<1x16x128xf32>
    %132 = arith.addf %119, %131 : vector<1x16x128xf32>
    %133 = arith.addf %120, %130 : vector<1x16x128xf32>
    %c2_i32_46 = arith.constant 2 : i32
    %134 = arith.addi %c0_i32, %c2_i32_46 : i32
    %135 = arith.index_cast %134 : i32 to index
    %c0_47 = arith.constant 0 : index
    %c0_48 = arith.constant 0 : index
    %136 = vector.load %arg1[%135, %c0_47, %c0_48] : memref<5x20x128xf32, #tpu.memory_space<vmem>>, vector<1x16x128xf32>
    %137 = arith.subf %136, %2 : vector<1x16x128xf32>
    %138 = arith.mulf %137, %137 : vector<1x16x128xf32>
    %cst_49 = arith.constant -5.000000e-01 : f32
    %139 = vector.broadcast %cst_49 : f32 to vector<1x16x128xf32>
    %140 = arith.mulf %138, %139 : vector<1x16x128xf32>
    %141 = math.exp %140 : vector<1x16x128xf32>
    %cst_50 = arith.constant 0.135335281 : f32
    %142 = vector.broadcast %cst_50 : f32 to vector<1x16x128xf32>
    %143 = arith.mulf %141, %142 : vector<1x16x128xf32>
    %144 = arith.mulf %143, %136 : vector<1x16x128xf32>
    %145 = arith.addf %132, %144 : vector<1x16x128xf32>
    %146 = arith.addf %133, %143 : vector<1x16x128xf32>
    %c2_i32_51 = arith.constant 2 : i32
    %147 = arith.addi %c0_i32, %c2_i32_51 : i32
    %148 = arith.index_cast %147 : i32 to index
    %c1_52 = arith.constant 1 : index
    %c0_53 = arith.constant 0 : index
    %149 = vector.load %arg1[%148, %c1_52, %c0_53] : memref<5x20x128xf32, #tpu.memory_space<vmem>>, vector<1x16x128xf32>
    %150 = arith.subf %149, %2 : vector<1x16x128xf32>
    %151 = arith.mulf %150, %150 : vector<1x16x128xf32>
    %cst_54 = arith.constant -5.000000e-01 : f32
    %152 = vector.broadcast %cst_54 : f32 to vector<1x16x128xf32>
    %153 = arith.mulf %151, %152 : vector<1x16x128xf32>
    %154 = math.exp %153 : vector<1x16x128xf32>
    %cst_55 = arith.constant 0.606530666 : f32
    %155 = vector.broadcast %cst_55 : f32 to vector<1x16x128xf32>
    %156 = arith.mulf %154, %155 : vector<1x16x128xf32>
    %157 = arith.mulf %156, %149 : vector<1x16x128xf32>
    %158 = arith.addf %145, %157 : vector<1x16x128xf32>
    %159 = arith.addf %146, %156 : vector<1x16x128xf32>
    %c2_i32_56 = arith.constant 2 : i32
    %160 = arith.addi %c0_i32, %c2_i32_56 : i32
    %161 = arith.index_cast %160 : i32 to index
    %c3_57 = arith.constant 3 : index
    %c0_58 = arith.constant 0 : index
    %162 = vector.load %arg1[%161, %c3_57, %c0_58] : memref<5x20x128xf32, #tpu.memory_space<vmem>>, vector<1x16x128xf32>
    %163 = arith.subf %162, %2 : vector<1x16x128xf32>
    %164 = arith.mulf %163, %163 : vector<1x16x128xf32>
    %cst_59 = arith.constant -5.000000e-01 : f32
    %165 = vector.broadcast %cst_59 : f32 to vector<1x16x128xf32>
    %166 = arith.mulf %164, %165 : vector<1x16x128xf32>
    %167 = math.exp %166 : vector<1x16x128xf32>
    %cst_60 = arith.constant 0.606530666 : f32
    %168 = vector.broadcast %cst_60 : f32 to vector<1x16x128xf32>
    %169 = arith.mulf %167, %168 : vector<1x16x128xf32>
    %170 = arith.mulf %169, %162 : vector<1x16x128xf32>
    %171 = arith.addf %158, %170 : vector<1x16x128xf32>
    %172 = arith.addf %159, %169 : vector<1x16x128xf32>
    %c2_i32_61 = arith.constant 2 : i32
    %173 = arith.addi %c0_i32, %c2_i32_61 : i32
    %174 = arith.index_cast %173 : i32 to index
    %c4_62 = arith.constant 4 : index
    %c0_63 = arith.constant 0 : index
    %175 = vector.load %arg1[%174, %c4_62, %c0_63] : memref<5x20x128xf32, #tpu.memory_space<vmem>>, vector<1x16x128xf32>
    %176 = arith.subf %175, %2 : vector<1x16x128xf32>
    %177 = arith.mulf %176, %176 : vector<1x16x128xf32>
    %cst_64 = arith.constant -5.000000e-01 : f32
    %178 = vector.broadcast %cst_64 : f32 to vector<1x16x128xf32>
    %179 = arith.mulf %177, %178 : vector<1x16x128xf32>
    %180 = math.exp %179 : vector<1x16x128xf32>
    %cst_65 = arith.constant 0.135335281 : f32
    %181 = vector.broadcast %cst_65 : f32 to vector<1x16x128xf32>
    %182 = arith.mulf %180, %181 : vector<1x16x128xf32>
    %183 = arith.mulf %182, %175 : vector<1x16x128xf32>
    %184 = arith.addf %171, %183 : vector<1x16x128xf32>
    %185 = arith.addf %172, %182 : vector<1x16x128xf32>
    %c3_i32 = arith.constant 3 : i32
    %186 = arith.addi %c0_i32, %c3_i32 : i32
    %187 = arith.index_cast %186 : i32 to index
    %c0_66 = arith.constant 0 : index
    %c0_67 = arith.constant 0 : index
    %188 = vector.load %arg1[%187, %c0_66, %c0_67] : memref<5x20x128xf32, #tpu.memory_space<vmem>>, vector<1x16x128xf32>
    %189 = arith.subf %188, %2 : vector<1x16x128xf32>
    %190 = arith.mulf %189, %189 : vector<1x16x128xf32>
    %cst_68 = arith.constant -5.000000e-01 : f32
    %191 = vector.broadcast %cst_68 : f32 to vector<1x16x128xf32>
    %192 = arith.mulf %190, %191 : vector<1x16x128xf32>
    %193 = math.exp %192 : vector<1x16x128xf32>
    %cst_69 = arith.constant 0.0820850059 : f32
    %194 = vector.broadcast %cst_69 : f32 to vector<1x16x128xf32>
    %195 = arith.mulf %193, %194 : vector<1x16x128xf32>
    %196 = arith.mulf %195, %188 : vector<1x16x128xf32>
    %197 = arith.addf %184, %196 : vector<1x16x128xf32>
    %198 = arith.addf %185, %195 : vector<1x16x128xf32>
    %c3_i32_70 = arith.constant 3 : i32
    %199 = arith.addi %c0_i32, %c3_i32_70 : i32
    %200 = arith.index_cast %199 : i32 to index
    %c1_71 = arith.constant 1 : index
    %c0_72 = arith.constant 0 : index
    %201 = vector.load %arg1[%200, %c1_71, %c0_72] : memref<5x20x128xf32, #tpu.memory_space<vmem>>, vector<1x16x128xf32>
    %202 = arith.subf %201, %2 : vector<1x16x128xf32>
    %203 = arith.mulf %202, %202 : vector<1x16x128xf32>
    %cst_73 = arith.constant -5.000000e-01 : f32
    %204 = vector.broadcast %cst_73 : f32 to vector<1x16x128xf32>
    %205 = arith.mulf %203, %204 : vector<1x16x128xf32>
    %206 = math.exp %205 : vector<1x16x128xf32>
    %cst_74 = arith.constant 0.367879421 : f32
    %207 = vector.broadcast %cst_74 : f32 to vector<1x16x128xf32>
    %208 = arith.mulf %206, %207 : vector<1x16x128xf32>
    %209 = arith.mulf %208, %201 : vector<1x16x128xf32>
    %210 = arith.addf %197, %209 : vector<1x16x128xf32>
    %211 = arith.addf %198, %208 : vector<1x16x128xf32>
    %c3_i32_75 = arith.constant 3 : i32
    %212 = arith.addi %c0_i32, %c3_i32_75 : i32
    %213 = arith.index_cast %212 : i32 to index
    %c2_76 = arith.constant 2 : index
    %c0_77 = arith.constant 0 : index
    %214 = vector.load %arg1[%213, %c2_76, %c0_77] : memref<5x20x128xf32, #tpu.memory_space<vmem>>, vector<1x16x128xf32>
    %215 = arith.subf %214, %2 : vector<1x16x128xf32>
    %216 = arith.mulf %215, %215 : vector<1x16x128xf32>
    %cst_78 = arith.constant -5.000000e-01 : f32
    %217 = vector.broadcast %cst_78 : f32 to vector<1x16x128xf32>
    %218 = arith.mulf %216, %217 : vector<1x16x128xf32>
    %219 = math.exp %218 : vector<1x16x128xf32>
    %cst_79 = arith.constant 0.606530666 : f32
    %220 = vector.broadcast %cst_79 : f32 to vector<1x16x128xf32>
    %221 = arith.mulf %219, %220 : vector<1x16x128xf32>
    %222 = arith.mulf %221, %214 : vector<1x16x128xf32>
    %223 = arith.addf %210, %222 : vector<1x16x128xf32>
    %224 = arith.addf %211, %221 : vector<1x16x128xf32>
    %c3_i32_80 = arith.constant 3 : i32
    %225 = arith.addi %c0_i32, %c3_i32_80 : i32
    %226 = arith.index_cast %225 : i32 to index
    %c3_81 = arith.constant 3 : index
    %c0_82 = arith.constant 0 : index
    %227 = vector.load %arg1[%226, %c3_81, %c0_82] : memref<5x20x128xf32, #tpu.memory_space<vmem>>, vector<1x16x128xf32>
    %228 = arith.subf %227, %2 : vector<1x16x128xf32>
    %229 = arith.mulf %228, %228 : vector<1x16x128xf32>
    %cst_83 = arith.constant -5.000000e-01 : f32
    %230 = vector.broadcast %cst_83 : f32 to vector<1x16x128xf32>
    %231 = arith.mulf %229, %230 : vector<1x16x128xf32>
    %232 = math.exp %231 : vector<1x16x128xf32>
    %cst_84 = arith.constant 0.367879421 : f32
    %233 = vector.broadcast %cst_84 : f32 to vector<1x16x128xf32>
    %234 = arith.mulf %232, %233 : vector<1x16x128xf32>
    %235 = arith.mulf %234, %227 : vector<1x16x128xf32>
    %236 = arith.addf %223, %235 : vector<1x16x128xf32>
    %237 = arith.addf %224, %234 : vector<1x16x128xf32>
    %c3_i32_85 = arith.constant 3 : i32
    %238 = arith.addi %c0_i32, %c3_i32_85 : i32
    %239 = arith.index_cast %238 : i32 to index
    %c4_86 = arith.constant 4 : index
    %c0_87 = arith.constant 0 : index
    %240 = vector.load %arg1[%239, %c4_86, %c0_87] : memref<5x20x128xf32, #tpu.memory_space<vmem>>, vector<1x16x128xf32>
    %241 = arith.subf %240, %2 : vector<1x16x128xf32>
    %242 = arith.mulf %241, %241 : vector<1x16x128xf32>
    %cst_88 = arith.constant -5.000000e-01 : f32
    %243 = vector.broadcast %cst_88 : f32 to vector<1x16x128xf32>
    %244 = arith.mulf %242, %243 : vector<1x16x128xf32>
    %245 = math.exp %244 : vector<1x16x128xf32>
    %cst_89 = arith.constant 0.0820850059 : f32
    %246 = vector.broadcast %cst_89 : f32 to vector<1x16x128xf32>
    %247 = arith.mulf %245, %246 : vector<1x16x128xf32>
    %248 = arith.mulf %247, %240 : vector<1x16x128xf32>
    %249 = arith.addf %236, %248 : vector<1x16x128xf32>
    %250 = arith.addf %237, %247 : vector<1x16x128xf32>
    %c4_i32 = arith.constant 4 : i32
    %251 = arith.addi %c0_i32, %c4_i32 : i32
    %252 = arith.index_cast %251 : i32 to index
    %c0_90 = arith.constant 0 : index
    %c0_91 = arith.constant 0 : index
    %253 = vector.load %arg1[%252, %c0_90, %c0_91] : memref<5x20x128xf32, #tpu.memory_space<vmem>>, vector<1x16x128xf32>
    %254 = arith.subf %253, %2 : vector<1x16x128xf32>
    %255 = arith.mulf %254, %254 : vector<1x16x128xf32>
    %cst_92 = arith.constant -5.000000e-01 : f32
    %256 = vector.broadcast %cst_92 : f32 to vector<1x16x128xf32>
    %257 = arith.mulf %255, %256 : vector<1x16x128xf32>
    %258 = math.exp %257 : vector<1x16x128xf32>
    %cst_93 = arith.constant 0.0183156393 : f32
    %259 = vector.broadcast %cst_93 : f32 to vector<1x16x128xf32>
    %260 = arith.mulf %258, %259 : vector<1x16x128xf32>
    %261 = arith.mulf %260, %253 : vector<1x16x128xf32>
    %262 = arith.addf %249, %261 : vector<1x16x128xf32>
    %263 = arith.addf %250, %260 : vector<1x16x128xf32>
    %c4_i32_94 = arith.constant 4 : i32
    %264 = arith.addi %c0_i32, %c4_i32_94 : i32
    %265 = arith.index_cast %264 : i32 to index
    %c1_95 = arith.constant 1 : index
    %c0_96 = arith.constant 0 : index
    %266 = vector.load %arg1[%265, %c1_95, %c0_96] : memref<5x20x128xf32, #tpu.memory_space<vmem>>, vector<1x16x128xf32>
    %267 = arith.subf %266, %2 : vector<1x16x128xf32>
    %268 = arith.mulf %267, %267 : vector<1x16x128xf32>
    %cst_97 = arith.constant -5.000000e-01 : f32
    %269 = vector.broadcast %cst_97 : f32 to vector<1x16x128xf32>
    %270 = arith.mulf %268, %269 : vector<1x16x128xf32>
    %271 = math.exp %270 : vector<1x16x128xf32>
    %cst_98 = arith.constant 0.0820850059 : f32
    %272 = vector.broadcast %cst_98 : f32 to vector<1x16x128xf32>
    %273 = arith.mulf %271, %272 : vector<1x16x128xf32>
    %274 = arith.mulf %273, %266 : vector<1x16x128xf32>
    %275 = arith.addf %262, %274 : vector<1x16x128xf32>
    %276 = arith.addf %263, %273 : vector<1x16x128xf32>
    %c4_i32_99 = arith.constant 4 : i32
    %277 = arith.addi %c0_i32, %c4_i32_99 : i32
    %278 = arith.index_cast %277 : i32 to index
    %c2_100 = arith.constant 2 : index
    %c0_101 = arith.constant 0 : index
    %279 = vector.load %arg1[%278, %c2_100, %c0_101] : memref<5x20x128xf32, #tpu.memory_space<vmem>>, vector<1x16x128xf32>
    %280 = arith.subf %279, %2 : vector<1x16x128xf32>
    %281 = arith.mulf %280, %280 : vector<1x16x128xf32>
    %cst_102 = arith.constant -5.000000e-01 : f32
    %282 = vector.broadcast %cst_102 : f32 to vector<1x16x128xf32>
    %283 = arith.mulf %281, %282 : vector<1x16x128xf32>
    %284 = math.exp %283 : vector<1x16x128xf32>
    %cst_103 = arith.constant 0.135335281 : f32
    %285 = vector.broadcast %cst_103 : f32 to vector<1x16x128xf32>
    %286 = arith.mulf %284, %285 : vector<1x16x128xf32>
    %287 = arith.mulf %286, %279 : vector<1x16x128xf32>
    %288 = arith.addf %275, %287 : vector<1x16x128xf32>
    %289 = arith.addf %276, %286 : vector<1x16x128xf32>
    %c4_i32_104 = arith.constant 4 : i32
    %290 = arith.addi %c0_i32, %c4_i32_104 : i32
    %291 = arith.index_cast %290 : i32 to index
    %c3_105 = arith.constant 3 : index
    %c0_106 = arith.constant 0 : index
    %292 = vector.load %arg1[%291, %c3_105, %c0_106] : memref<5x20x128xf32, #tpu.memory_space<vmem>>, vector<1x16x128xf32>
    %293 = arith.subf %292, %2 : vector<1x16x128xf32>
    %294 = arith.mulf %293, %293 : vector<1x16x128xf32>
    %cst_107 = arith.constant -5.000000e-01 : f32
    %295 = vector.broadcast %cst_107 : f32 to vector<1x16x128xf32>
    %296 = arith.mulf %294, %295 : vector<1x16x128xf32>
    %297 = math.exp %296 : vector<1x16x128xf32>
    %cst_108 = arith.constant 0.0820850059 : f32
    %298 = vector.broadcast %cst_108 : f32 to vector<1x16x128xf32>
    %299 = arith.mulf %297, %298 : vector<1x16x128xf32>
    %300 = arith.mulf %299, %292 : vector<1x16x128xf32>
    %301 = arith.addf %288, %300 : vector<1x16x128xf32>
    %302 = arith.addf %289, %299 : vector<1x16x128xf32>
    %c4_i32_109 = arith.constant 4 : i32
    %303 = arith.addi %c0_i32, %c4_i32_109 : i32
    %304 = arith.index_cast %303 : i32 to index
    %c4_110 = arith.constant 4 : index
    %c0_111 = arith.constant 0 : index
    %305 = vector.load %arg1[%304, %c4_110, %c0_111] : memref<5x20x128xf32, #tpu.memory_space<vmem>>, vector<1x16x128xf32>
    %306 = arith.subf %305, %2 : vector<1x16x128xf32>
    %307 = arith.mulf %306, %306 : vector<1x16x128xf32>
    %cst_112 = arith.constant -5.000000e-01 : f32
    %308 = vector.broadcast %cst_112 : f32 to vector<1x16x128xf32>
    %309 = arith.mulf %307, %308 : vector<1x16x128xf32>
    %310 = math.exp %309 : vector<1x16x128xf32>
    %cst_113 = arith.constant 0.0183156393 : f32
    %311 = vector.broadcast %cst_113 : f32 to vector<1x16x128xf32>
    %312 = arith.mulf %310, %311 : vector<1x16x128xf32>
    %313 = arith.mulf %312, %305 : vector<1x16x128xf32>
    %314 = arith.addf %301, %313 : vector<1x16x128xf32>
    %315 = arith.addf %302, %312 : vector<1x16x128xf32>
    %316 = arith.divf %314, %315 : vector<1x16x128xf32>
    %317 = arith.index_cast %c0_i32 : i32 to index
    %c0_114 = arith.constant 0 : index
    %c0_115 = arith.constant 0 : index
    %318 = vector.load %arg2[%317, %c0_114, %c0_115] : memref<1x16x128xf32, #tpu.memory_space<vmem>>, vector<1x16x128xf32>
    tpu.vector_store %arg2[%317, %c0_114, %c0_115], %316 {strides = array<i32>} : memref<1x16x128xf32, #tpu.memory_space<vmem>>, vector<1x16x128xf32>,
    %c1_i32_116 = arith.constant 1 : i32
    return
  }
  func.func @transform_0(%arg0: i32) -> (i32, i32, i32) {
    %c0_i32 = arith.constant 0 : i32
    %c0_i32_0 = arith.constant 0 : i32
    %c0_i32_1 = arith.constant 0 : i32
    return %c0_i32, %c0_i32_0, %arg0 : i32, i32, i32
  }
  func.func @transform_1(%arg0: i32) -> (i32, i32, i32) {
    %c0_i32 = arith.constant 0 : i32
    %c0_i32_0 = arith.constant 0 : i32
    %c0_i32_1 = arith.constant 0 : i32
    return %c0_i32, %c0_i32_0, %arg0 : i32, i32, i32
  }
}

</mosaic_0001>

<bundles_post_ra>
// kernel: bilateral_filter.1
= control target key start
LH: loop header
LB: loop body
LE: loop exit
PB: predicated region body
PF: predicated region fallthrough
CT: control target
= control target key end

     0   :  { %s1083_s0 = inlined_call_operand.vmem [shape: f32[5,20,128], index: 0, kind: input, shape index: {}]   ;;  %s1084_s1 = inlined_call_operand.vmem [shape: f32[1,16,128], index: 1, kind: output, shape index: {}]  }
   0x1   :  { %v657_v0 = vld [vmem:[%s1083_s0 + $0x32] sm:$0xff]  ;;  %v662_v1 = vld [vmem:[%s1083_s0 + $0x3a] sm:$0xff]  ;;  %v672_v3 = vld [vmem:[%s1083_s0 + $0x8] sm:$0xff] }
   0x2   :  { %v667_v2 = vld [vmem:[%s1083_s0] sm:$0xff]  ;;  %v684_v6 = vld [vmem:[%s1083_s0 + $0x9] sm:$0xff]  ;;  %v14_v7 = vsub.f32 %v672_v3, %v662_v1  ;;  %v733_v32 = vld [vmem:[%s1083_s0 + $0x18] sm:$0xff] }
   0x3   :  { %v13_v4 = vsub.f32 %v667_v2, %v657_v0  ;;  %v679_v5 = vld [vmem:[%s1083_s0 + $0x1] sm:$0xff]  ;;  %v34_v9 = vsub.f32 %v684_v6, %v662_v1  ;;  %v700_v11 = vld [vmem:[%s1083_s0 + $0xa] sm:$0xff]  ;;  %v745_v45 = vld [vmem:[%s1083_s0 + $0x19] sm:$0xff]  ;;  %v114_v51 = vsub.f32 %v733_v32, %v657_v0 }
   0x4   :  { %v33_v8 = vsub.f32 %v679_v5, %v657_v0  ;;  %v695_v10 = vld [vmem:[%s1083_s0 + $0x2] sm:$0xff]  ;;  %v54_v15 = vsub.f32 %v700_v11, %v662_v1  ;;  %v714_v16 = vld [vmem:[%s1083_s0 + $0xb] sm:$0xff]  ;;  %v16_v18 = vmul.f32 %v14_v7, %v14_v7  ;;  %v134_v55 = vsub.f32 %v745_v45, %v657_v0  ;;  %v765_v59 = vld [vmem:[%s1083_s0 + $0x1a] sm:$0xff] }
   0x5   :  { %v705_v12 = vld [vmem:[%s1083_s0 + $0x3] sm:$0xff]  ;;  %v15_v13 = vmul.f32 %v13_v4, %v13_v4  ;;  %v53_v14 = vsub.f32 %v695_v10, %v657_v0  ;;  %v36_v20 = vmul.f32 %v34_v9, %v34_v9  ;;  %v74_v21 = vsub.f32 %v714_v16, %v662_v1  ;;  %v728_v31 = vld [vmem:[%s1083_s0 + $0xc] sm:$0xff] }
   0x6   :  { %v73_v17 = vsub.f32 %v705_v12, %v657_v0  ;;  %v35_v19 = vmul.f32 %v33_v8, %v33_v8  ;;  %v56_v24 = vmul.f32 %v54_v15, %v54_v15  ;;  %v723_v26 = vld [vmem:[%s1083_s0 + $0x4] sm:$0xff]  ;;  %v18_v27 = vmul.f32 -0.5, %v16_v18  ;;  %v777_v15 = vld [vmem:[%s1083_s0 + $0x1b] sm:$0xff] }
   0x7   :  { %v17_v22 = vmul.f32 -0.5, %v15_v13  ;;  %v55_v23 = vmul.f32 %v53_v14, %v53_v14  ;;  %v38_v29 = vmul.f32 -0.5, %v36_v20  ;;  %v76_v30 = vmul.f32 %v74_v21, %v74_v21  ;;  %v738_v37 = vld [vmem:[%s1083_s0 + $0x20] sm:$0xff] }
   0x8   :  { %v75_v25 = vmul.f32 %v73_v17, %v73_v17  ;;  %v37_v28 = vmul.f32 -0.5, %v35_v19  ;;  %v58_v35 = vmul.f32 -0.5, %v56_v24  ;;  %v21_v38 = vmul.f32 1.442695, %v18_v27  ;;  %v752_v49 = vld [vmem:[%s1083_s0 + $0x21] sm:$0xff] }
   0x9   :  { %v19_v33 = vmul.f32 1.442695, %v17_v22  ;;  %v57_v34 = vmul.f32 -0.5, %v55_v23  ;;  %v41_v40 = vmul.f32 1.442695, %v38_v29  ;;  %v93_v41 = vsub.f32 %v723_v26, %v657_v0  ;;  %v770_v8 = vld [vmem:[%s1083_s0 + $0x22] sm:$0xff] }
   0xa   :  { %v77_v36 = vmul.f32 -0.5, %v75_v25  ;;  %v39_v39 = vmul.f32 1.442695, %v37_v28  ;;  %v61_v43 = vmul.f32 1.442695, %v58_v35  ;;  %v78_v44 = vmul.f32 -0.5, %v76_v30 }
   0xb   :  { %544 = vpow2.f32 %v19_v33  ;;  %v59_v42 = vmul.f32 1.442695, %v57_v34  ;;  %v94_v47 = vsub.f32 %v728_v31, %v662_v1  ;;  %v95_v48 = vmul.f32 %v93_v41, %v93_v41  ;;  %v782_v17 = vld [vmem:[%s1083_s0 + $0x23] sm:$0xff] }
   0xc   :  { %546 = vpow2.f32 %v21_v38  ;;  %v79_v46 = vmul.f32 1.442695, %v77_v36  ;;  %v81_v50 = vmul.f32 1.442695, %v78_v44  ;;  %v115_v52 = vsub.f32 %v738_v37, %v662_v1 }
   0xd   :  { %548 = vpow2.f32 %v39_v39  ;;  %v96_v53 = vmul.f32 %v94_v47, %v94_v47  ;;  %v97_v54 = vmul.f32 -0.5, %v95_v48  ;;  %v116_v56 = vmul.f32 %v114_v51, %v114_v51 }
   0xe   :  { %550 = vpow2.f32 %v41_v40  ;;  %v117_v57 = vmul.f32 %v115_v52, %v115_v52  ;;  %v135_v58 = vsub.f32 %v752_v49, %v662_v1  ;;  %v136_v62 = vmul.f32 %v134_v55, %v134_v55 }
   0xf   :  { %552 = vpow2.f32 %v59_v42  ;;  %v98_v60 = vmul.f32 -0.5, %v96_v53  ;;  %v99_v61 = vmul.f32 1.442695, %v97_v54  ;;  %v118_v63 = vmul.f32 -0.5, %v116_v56 }
  0x10   :  { %554 = vpow2.f32 %v61_v43  ;;  %v119_v4 = vmul.f32 -0.5, %v117_v57  ;;  %v137_v7 = vmul.f32 %v135_v58, %v135_v58  ;;  %v138_v13 = vmul.f32 -0.5, %v136_v62 }
  0x11   :  { %556 = vpow2.f32 %v79_v46  ;;  %v101_v9 = vmul.f32 1.442695, %v98_v60  ;;  %v154_v14 = vsub.f32 %v765_v59, %v657_v0  ;;  %v120_v18 = vmul.f32 1.442695, %v118_v63 }
  0x12   :  { %558 = vpow2.f32 %v81_v50  ;;  %v122_v19 = vmul.f32 1.442695, %v119_v4  ;;  %v139_v20 = vmul.f32 -0.5, %v137_v7  ;;  %v140_v21 = vmul.f32 1.442695, %v138_v13 }
  0x13   :  { %560 = vpow2.f32 %v99_v61  ;;  %v155_v22 = vsub.f32 %v770_v8, %v662_v1  ;;  %v156_v23 = vmul.f32 %v154_v14, %v154_v14  ;;  %v174_v27 = vsub.f32 %v777_v15, %v657_v0 }
  0x14   :  { %562 = vpow2.f32 %v101_v9  ;;  %v142_v25 = vmul.f32 1.442695, %v139_v20  ;;  %v175_v28 = vsub.f32 %v782_v17, %v662_v1 }
  0x15   :  { %v545_v24 = vpop.eup %544  ;;  %564 = vpow2.f32 %v120_v18  ;;  %v157_v33 = vmul.f32 %v155_v22, %v155_v22  ;;  %v790_v34 = vmul.f32 -0.5, %v156_v23  ;;  %v792_v38 = vmul.f32 %v174_v27, %v174_v27 }
  0x16   :  { %v547_v29 = vpop.eup %546  ;;  %v23_v30 = vmul.f32 0.01831564, %v545_v24  ;;  %566 = vpow2.f32 %v122_v19  ;;  %v794_v39 = vmul.f32 %v175_v28, %v175_v28 }
  0x17   :  { %v549_v35 = vpop.eup %548  ;;  %v24_v36 = vmul.f32 0.01831564, %v547_v29  ;;  %568 = vpow2.f32 %v140_v21  ;;  %v159_v50 = vmul.f32 -0.5, %v157_v33 }
  0x18   :  { %v551_v40 = vpop.eup %550  ;;  %v25_v41 = vmul.f32 %v23_v30, %v667_v2  ;;  %v29_v42 = vadd.f32 1.0, %v23_v30  ;;  %v43_v43 = vmul.f32 0.082085006, %v549_v35  ;;  %570 = vpow2.f32 %v142_v25 }
  0x19   :  { %v553_v44 = vpop.eup %552  ;;  %v26_v46 = vmul.f32 %v24_v36, %v672_v3  ;;  %v30_v47 = vadd.f32 1.0, %v24_v36  ;;  %v44_v48 = vmul.f32 0.082085006, %v551_v40 }
  0x1a   :  { %v555_v51 = vpop.eup %554  ;;  %v27_v52 = vadd.f32 %v657_v0, %v25_v41  ;;  %v45_v53 = vmul.f32 %v43_v43, %v679_v5  ;;  %v49_v54 = vadd.f32 %v43_v43, %v29_v42  ;;  %v63_v55 = vmul.f32 0.13533528, %v553_v44 }
  0x1b   :  { %v557_v56 = vpop.eup %556  ;;  %v28_v57 = vadd.f32 %v662_v1, %v26_v46  ;;  %v46_v2 = vmul.f32 %v44_v48, %v684_v6  ;;  %v50_v58 = vadd.f32 %v44_v48, %v30_v47  ;;  %v64_v60 = vmul.f32 0.13533528, %v555_v51 }
  0x1c   :  { %v559_v61 = vpop.eup %558  ;;  %v47_v62 = vadd.f32 %v45_v53, %v27_v52  ;;  %v65_v3 = vmul.f32 %v63_v55, %v695_v10  ;;  %v69_v63 = vadd.f32 %v63_v55, %v49_v54  ;;  %v83_v4 = vmul.f32 0.082085006, %v557_v56  ;;  %v837_v56 = vld [vmem:[%s1083_s0 + $0x38] sm:$0xff] }
  0x1d   :  { %v561_v7 = vpop.eup %560  ;;  %v48_v9 = vadd.f32 %v46_v2, %v28_v57  ;;  %v66_v13 = vmul.f32 %v64_v60, %v700_v11  ;;  %v70_v5 = vadd.f32 %v64_v60, %v50_v58  ;;  %v84_v14 = vmul.f32 0.082085006, %v559_v61  ;;  %v851_v58 = vld [vmem:[%s1083_s0 + $0x39] sm:$0xff] }
  0x1e   :  { %v563_v18 = vpop.eup %562  ;;  %v67_v19 = vadd.f32 %v65_v3, %v47_v62  ;;  %v85_v20 = vmul.f32 %v83_v4, %v705_v12  ;;  %v89_v21 = vadd.f32 %v83_v4, %v69_v63  ;;  %v103_v6 = vmul.f32 0.01831564, %v561_v7 }
  0x1f   :  { %v565_v22 = vpop.eup %564  ;;  %v68_v23 = vadd.f32 %v66_v13, %v48_v9  ;;  %v86_v24 = vmul.f32 %v84_v14, %v714_v16  ;;  %v90_v25 = vadd.f32 %v84_v14, %v70_v5  ;;  %v104_v10 = vmul.f32 0.01831564, %v563_v18  ;;  %v875_v14 = vld [vmem:[%s1083_s0 + $0x3b] sm:$0xff] }
  0x20   :  { %v567_v27 = vpop.eup %566  ;;  %v87_v28 = vadd.f32 %v85_v20, %v67_v19  ;;  %v105_v29 = vmul.f32 %v103_v6, %v723_v26  ;;  %v109_v30 = vadd.f32 %v103_v6, %v89_v21  ;;  %v124_v11 = vmul.f32 0.082085006, %v565_v22 }
  0x21   :  { %v569_v33 = vpop.eup %568  ;;  %v88_v35 = vadd.f32 %v86_v24, %v68_v23  ;;  %v106_v36 = vmul.f32 %v104_v10, %v728_v31  ;;  %v110_v40 = vadd.f32 %v104_v10, %v90_v25  ;;  %v125_v12 = vmul.f32 0.082085006, %v567_v27  ;;  %v815_v31 = vld [vmem:[%s1083_s0 + $0x1c] sm:$0xff]  ;;  %v884_v27 = vld [vmem:[%s1083_s0 + $0x34] sm:$0xff] }
  0x22   :  { %v571_v41 = vpop.eup %570  ;;  %v107_v42 = vadd.f32 %v105_v29, %v87_v28  ;;  %v126_v43 = vmul.f32 %v733_v32, %v124_v11  ;;  %v130_v44 = vadd.f32 %v124_v11, %v109_v30  ;;  %v144_v16 = vmul.f32 0.36787942, %v569_v33  ;;  %v820_v32 = vld [vmem:[%s1083_s0 + $0x24] sm:$0xff]  ;;  %v889_v33 = vld [vmem:[%s1083_s0 + $0x3c] sm:$0xff] }
  0x23   :  { %v108_v46 = vadd.f32 %v106_v36, %v88_v35  ;;  %v127_v47 = vmul.f32 %v738_v37, %v125_v12  ;;  %v131_v48 = vadd.f32 %v125_v12, %v110_v40  ;;  %v145_v51 = vmul.f32 0.36787942, %v571_v41 }
  0x24   :  { %v128_v26 = vadd.f32 %v126_v43, %v107_v42  ;;  %v146_v52 = vmul.f32 %v745_v45, %v144_v16  ;;  %v160_v53 = vmul.f32 1.442695, %v790_v34  ;;  %v827_v55 = vadd.f32 %v144_v16, %v130_v44  ;;  %v832_v34 = vld [vmem:[%s1083_s0 + $0x30] sm:$0xff] }
  0x25   :  { %v822_v54 = vadd.f32 %v127_v47, %v108_v46  ;;  %v825_v37 = vmul.f32 %v752_v49, %v145_v51  ;;  %v162_v45 = vmul.f32 1.442695, %v159_v50  ;;  %v839_v57 = vadd.f32 %v145_v51, %v131_v48  ;;  %v846_v50 = vld [vmem:[%s1083_s0 + $0x31] sm:$0xff] }
  0x26   :  { %572 = vpow2.f32 %v160_v53  ;;  %v178_v2 = vmul.f32 -0.5, %v792_v38  ;;  %v179_v49 = vmul.f32 -0.5, %v794_v39  ;;  %v853_v60 = vadd.f32 %v146_v52, %v128_v26  ;;  %v862_v39 = vld [vmem:[%s1083_s0 + $0x33] sm:$0xff] }
  0x27   :  { %574 = vpow2.f32 %v162_v45  ;;  %v194_v61 = vsub.f32 %v815_v31, %v657_v0  ;;  %v195_v38 = vsub.f32 %v820_v32, %v662_v1  ;;  %v214_v63 = vsub.f32 %v832_v34, %v657_v0 }
  0x28   :  { %v180_v62 = vmul.f32 1.442695, %v178_v2  ;;  %v182_v3 = vmul.f32 1.442695, %v179_v49  ;;  %v215_v4 = vsub.f32 %v837_v56, %v662_v1  ;;  %v234_v13 = vsub.f32 %v846_v50, %v657_v0 }
  0x29   :  { %v196_v7 = vmul.f32 %v194_v61, %v194_v61  ;;  %v197_v9 = vmul.f32 %v195_v38, %v195_v38  ;;  %v235_v5 = vsub.f32 %v851_v58, %v662_v1  ;;  %v216_v18 = vmul.f32 %v214_v63, %v214_v63 }
  0x2a   :  { %576 = vpow2.f32 %v180_v62  ;;  %v217_v19 = vmul.f32 %v215_v4, %v215_v4  ;;  %v254_v20 = vsub.f32 %v862_v39, %v657_v0  ;;  %v236_v22 = vmul.f32 %v234_v13, %v234_v13 }
  0x2b   :  { %578 = vpow2.f32 %v182_v3  ;;  %v198_v21 = vmul.f32 -0.5, %v196_v7  ;;  %v199_v6 = vmul.f32 -0.5, %v197_v9  ;;  %v218_v23 = vmul.f32 -0.5, %v216_v18  ;;  %v903_v7 = vld [vmem:[%s1083_s0 + $0x48] sm:$0xff] }
  0x2c   :  { %v219_v24 = vmul.f32 -0.5, %v217_v19  ;;  %v237_v25 = vmul.f32 %v235_v5, %v235_v5  ;;  %v255_v10 = vsub.f32 %v875_v14, %v662_v1  ;;  %v238_v30 = vmul.f32 -0.5, %v236_v22 }
  0x2d   :  { %v200_v28 = vmul.f32 1.442695, %v198_v21  ;;  %v202_v29 = vmul.f32 1.442695, %v199_v6  ;;  %v256_v11 = vmul.f32 %v254_v20, %v254_v20  ;;  %v220_v35 = vmul.f32 1.442695, %v218_v23 }
  0x2e   :  { %v222_v36 = vmul.f32 1.442695, %v219_v24  ;;  %v239_v40 = vmul.f32 -0.5, %v237_v25  ;;  %v257_v12 = vmul.f32 %v255_v10, %v255_v10  ;;  %v240_v41 = vmul.f32 1.442695, %v238_v30 }
  0x2f   :  { %580 = vpow2.f32 %v200_v28  ;;  %v258_v42 = vmul.f32 -0.5, %v256_v11  ;;  %v274_v43 = vsub.f32 %v884_v27, %v657_v0  ;;  %v275_v47 = vsub.f32 %v889_v33, %v662_v1 }
  0x30   :  { %v573_v44 = vpop.eup %572  ;;  %582 = vpow2.f32 %v202_v29  ;;  %v242_v16 = vmul.f32 1.442695, %v239_v40  ;;  %v259_v46 = vmul.f32 -0.5, %v257_v12  ;;  %v149_v49 = vadd.f32 %v825_v37, %v822_v54  ;;  %v909_v37 = vld [vmem:[%s1083_s0 + $0x50] sm:$0xff] }
  0x31   :  { %v575_v48 = vpop.eup %574  ;;  %v164_v51 = vmul.f32 0.60653067, %v573_v44  ;;  %584 = vpow2.f32 %v220_v35  ;;  %v260_v26 = vmul.f32 1.442695, %v258_v42  ;;  %v276_v52 = vmul.f32 %v274_v43, %v274_v43 }
  0x32   :  { %v165_v53 = vmul.f32 0.60653067, %v575_v48  ;;  %586 = vpow2.f32 %v222_v36  ;;  %v262_v45 = vmul.f32 1.442695, %v259_v46  ;;  %v277_v2 = vmul.f32 %v275_v47, %v275_v47 }
  0x33   :  { %v166_v61 = vmul.f32 %v765_v59, %v164_v51  ;;  %588 = vpow2.f32 %v240_v41  ;;  %v278_v38 = vmul.f32 -0.5, %v276_v52  ;;  %v170_v63 = vadd.f32 %v164_v51, %v827_v55 }
  0x34   :  { %v577_v62 = vpop.eup %576  ;;  %v167_v3 = vmul.f32 %v770_v8, %v165_v53  ;;  %590 = vpow2.f32 %v242_v16  ;;  %v279_v4 = vmul.f32 -0.5, %v277_v2  ;;  %v171_v13 = vadd.f32 %v165_v53, %v839_v57 }
  0x35   :  { %v579_v9 = vpop.eup %578  ;;  %v184_v54 = vmul.f32 0.36787942, %v577_v62  ;;  %592 = vpow2.f32 %v260_v26  ;;  %v280_v59 = vmul.f32 1.442695, %v278_v38  ;;  %v168_v8 = vadd.f32 %v166_v61, %v853_v60  ;;  %v921_v60 = vld [vmem:[%s1083_s0 + $0x49] sm:$0xff] }
  0x36   :  { %v185_v55 = vmul.f32 0.36787942, %v579_v9  ;;  %594 = vpow2.f32 %v262_v45  ;;  %v282_v5 = vmul.f32 1.442695, %v279_v4  ;;  %v169_v18 = vadd.f32 %v167_v3, %v149_v49  ;;  %v940_v4 = vld [vmem:[%s1083_s0 + $0x4a] sm:$0xff] }
  0x37   :  { %v186_v19 = vmul.f32 %v777_v15, %v184_v54  ;;  %v295_v20 = vsub.f32 %v903_v7, %v657_v0  ;;  %v190_v21 = vadd.f32 %v184_v54, %v170_v63  ;;  %596 = vpow2.f32 %v280_v59 }
  0x38   :  { %v187_v57 = vmul.f32 %v782_v17, %v185_v55  ;;  %v296_v6 = vsub.f32 %v909_v37, %v662_v1  ;;  %v191_v23 = vadd.f32 %v185_v55, %v171_v13  ;;  %598 = vpow2.f32 %v282_v5  ;;  %v926_v17 = vld [vmem:[%s1083_s0 + $0x51] sm:$0xff] }
  0x39   :  { %v581_v22 = vpop.eup %580  ;;  %v297_v24 = vmul.f32 %v295_v20, %v295_v20  ;;  %v188_v15 = vadd.f32 %v186_v19, %v168_v8  ;;  %v315_v35 = vsub.f32 %v921_v60, %v657_v0  ;;  %v316_v47 = vsub.f32 %v926_v17, %v662_v1 }
  0x3a   :  { %v583_v25 = vpop.eup %582  ;;  %v204_v10 = vmul.f32 0.082085006, %v581_v22  ;;  %v189_v29 = vadd.f32 %v187_v57, %v169_v18  ;;  %v298_v11 = vmul.f32 %v296_v6, %v296_v6  ;;  %v335_v18 = vsub.f32 %v940_v4, %v657_v0 }
  0x3b   :  { %v585_v28 = vpop.eup %584  ;;  %v205_v30 = vmul.f32 0.082085006, %v583_v25  ;;  %v299_v42 = vmul.f32 -0.5, %v297_v24  ;;  %v317_v55 = vmul.f32 %v315_v35, %v315_v35  ;;  %v318_v5 = vmul.f32 %v316_v47, %v316_v47  ;;  %v961_v24 = vld [vmem:[%s1083_s0 + $0x53] sm:$0xff]  ;;  %v991_v47 = vld [vmem:[%s1083_s0 + $0x68] sm:$0xff] }
  0x3c   :  { %v587_v36 = vpop.eup %586  ;;  %v206_v40 = vmul.f32 %v815_v31, %v204_v10  ;;  %v210_v12 = vadd.f32 %v204_v10, %v190_v21  ;;  %v224_v41 = vmul.f32 0.13533528, %v585_v28  ;;  %v300_v3 = vmul.f32 -0.5, %v298_v11  ;;  %v968_v28 = vld [vmem:[%s1083_s0 + $0x4c] sm:$0xff] }
  0x3d   :  { %v589_v43 = vpop.eup %588  ;;  %v207_v44 = vmul.f32 %v820_v32, %v205_v30  ;;  %v211_v16 = vadd.f32 %v205_v30, %v191_v23  ;;  %v225_v46 = vmul.f32 0.13533528, %v587_v36  ;;  %v301_v63 = vmul.f32 1.442695, %v299_v42  ;;  %v980_v36 = vld [vmem:[%s1083_s0 + $0x60] sm:$0xff] }
  0x3e   :  { %v591_v48 = vpop.eup %590  ;;  %v208_v51 = vadd.f32 %v206_v40, %v188_v15  ;;  %v226_v26 = vmul.f32 %v832_v34, %v224_v41  ;;  %v230_v52 = vadd.f32 %v224_v41, %v210_v12  ;;  %v244_v53 = vmul.f32 0.60653067, %v589_v43 }
  0x3f   :  { %v593_v45 = vpop.eup %592  ;;  %v209_v2 = vadd.f32 %v207_v44, %v189_v29  ;;  %v227_v31 = vmul.f32 %v837_v56, %v225_v46  ;;  %v231_v49 = vadd.f32 %v225_v46, %v211_v16  ;;  %v245_v61 = vmul.f32 0.60653067, %v591_v48  ;;  %v973_v29 = vld [vmem:[%s1083_s0 + $0x54] sm:$0xff] }
  0x40   :  { %v595_v38 = vpop.eup %594  ;;  %v228_v62 = vadd.f32 %v226_v26, %v208_v51  ;;  %v246_v32 = vmul.f32 %v846_v50, %v244_v53  ;;  %v250_v13 = vadd.f32 %v244_v53, %v230_v52  ;;  %v264_v54 = vmul.f32 0.60653067, %v593_v45  ;;  %v946_v50 = vld [vmem:[%s1083_s0 + $0x52] sm:$0xff] }
  0x41   :  { %v229_v34 = vadd.f32 %v227_v31, %v209_v2  ;;  %v247_v9 = vmul.f32 %v851_v58, %v245_v61  ;;  %v597_v59 = vpop.eup %596  ;;  %v251_v56 = vadd.f32 %v245_v61, %v231_v49  ;;  %v265_v8 = vmul.f32 0.60653067, %v595_v38  ;;  %v954_v58 = vld [vmem:[%s1083_s0 + $0x4b] sm:$0xff] }
  0x42   :  { %v599_v19 = vpop.eup %598  ;;  %v248_v20 = vadd.f32 %v246_v32, %v228_v62  ;;  %v266_v57 = vmul.f32 %v862_v39, %v264_v54  ;;  %600 = vpow2.f32 %v301_v63  ;;  %v270_v6 = vadd.f32 %v264_v54, %v250_v13 }
  0x43   :  { %v956_v21 = vadd.f32 %v247_v9, %v229_v34  ;;  %v284_v22 = vmul.f32 0.13533528, %v597_v59  ;;  %v303_v23 = vmul.f32 1.442695, %v300_v3  ;;  %v271_v25 = vadd.f32 %v265_v8, %v251_v56  ;;  %v1000_v3 = vld [vmem:[%s1083_s0 + $0x61] sm:$0xff] }
  0x44   :  { %v319_v15 = vmul.f32 -0.5, %v317_v55  ;;  %v320_v10 = vmul.f32 -0.5, %v318_v5  ;;  %v336_v39 = vsub.f32 %v946_v50, %v662_v1  ;;  %v285_v30 = vmul.f32 0.13533528, %v599_v19  ;;  %v1006_v55 = vld [vmem:[%s1083_s0 + $0x69] sm:$0xff] }
  0x45   :  { %602 = vpow2.f32 %v303_v23  ;;  %v337_v11 = vmul.f32 %v335_v18, %v335_v18  ;;  %v355_v35 = vsub.f32 %v954_v58, %v657_v0  ;;  %v356_v42 = vsub.f32 %v961_v24, %v662_v1 }
  0x46   :  { %v321_v40 = vmul.f32 1.442695, %v319_v15  ;;  %v323_v12 = vmul.f32 1.442695, %v320_v10  ;;  %v338_v41 = vmul.f32 %v336_v39, %v336_v39  ;;  %v375_v16 = vsub.f32 %v968_v28, %v657_v0 }
  0x47   :  { %v339_v43 = vmul.f32 -0.5, %v337_v11  ;;  %v357_v44 = vmul.f32 %v355_v35, %v355_v35  ;;  %v376_v46 = vsub.f32 %v973_v29, %v662_v1  ;;  %v358_v51 = vmul.f32 %v356_v42, %v356_v42 }
  0x48   :  { %604 = vpow2.f32 %v321_v40  ;;  %v340_v48 = vmul.f32 -0.5, %v338_v41  ;;  %v396_v26 = vsub.f32 %v980_v36, %v657_v0  ;;  %v377_v45 = vmul.f32 %v375_v16, %v375_v16 }
  0x49   :  { %606 = vpow2.f32 %v323_v12  ;;  %v341_v52 = vmul.f32 1.442695, %v339_v43  ;;  %v359_v53 = vmul.f32 -0.5, %v357_v44  ;;  %v360_v31 = vmul.f32 -0.5, %v358_v51 }
  0x4a   :  { %v343_v2 = vmul.f32 1.442695, %v340_v48  ;;  %v378_v49 = vmul.f32 %v376_v46, %v376_v46  ;;  %v397_v61 = vsub.f32 %v991_v47, %v662_v1  ;;  %v379_v62 = vmul.f32 -0.5, %v377_v45 }
  0x4b   :  { %608 = vpow2.f32 %v341_v52  ;;  %v361_v38 = vmul.f32 1.442695, %v359_v53  ;;  %v398_v32 = vmul.f32 %v396_v26, %v396_v26  ;;  %v363_v34 = vmul.f32 1.442695, %v360_v31 }
  0x4c   :  { %v601_v63 = vpop.eup %600  ;;  %610 = vpow2.f32 %v343_v2  ;;  %v380_v9 = vmul.f32 -0.5, %v378_v49  ;;  %v399_v13 = vmul.f32 %v397_v61, %v397_v61  ;;  %v267_v54 = vmul.f32 %v875_v14, %v265_v8  ;;  %v1013_v14 = vld [vmem:[%s1083_s0 + $0x62] sm:$0xff] }
  0x4d   :  { %v290_v59 = vadd.f32 %v284_v22, %v270_v6  ;;  %v305_v56 = vmul.f32 0.082085006, %v601_v63  ;;  %612 = vpow2.f32 %v361_v38  ;;  %v381_v5 = vmul.f32 1.442695, %v379_v62 }
  0x4e   :  { %614 = vpow2.f32 %v363_v34  ;;  %v400_v18 = vmul.f32 -0.5, %v398_v32  ;;  %v416_v19 = vsub.f32 %v1000_v3, %v657_v0  ;;  %v268_v15 = vadd.f32 %v266_v57, %v248_v20 }
  0x4f   :  { %v603_v23 = vpop.eup %602  ;;  %v291_v10 = vadd.f32 %v285_v30, %v271_v25  ;;  %v383_v39 = vmul.f32 1.442695, %v380_v9  ;;  %v286_v8 = vmul.f32 %v884_v27, %v284_v22  ;;  %v401_v11 = vmul.f32 -0.5, %v399_v13 }
  0x50   :  { %v306_v6 = vmul.f32 0.082085006, %v603_v23  ;;  %v417_v35 = vsub.f32 %v1006_v55, %v662_v1  ;;  %v269_v40 = vadd.f32 %v267_v54, %v956_v21  ;;  %v287_v12 = vmul.f32 %v889_v33, %v285_v30  ;;  %v1025_v21 = vld [vmem:[%s1083_s0 + $0x6a] sm:$0xff] }
  0x51   :  { %v311_v41 = vadd.f32 %v305_v56, %v290_v59  ;;  %v418_v20 = vmul.f32 %v416_v19, %v416_v19  ;;  %616 = vpow2.f32 %v381_v5  ;;  %v402_v25 = vmul.f32 1.442695, %v400_v18 }
  0x52   :  { %v605_v57 = vpop.eup %604  ;;  %v419_v42 = vmul.f32 %v417_v35, %v417_v35  ;;  %v436_v43 = vsub.f32 %v1013_v14, %v657_v0  ;;  %v312_v27 = vadd.f32 %v306_v6, %v291_v10  ;;  %618 = vpow2.f32 %v383_v39 }
  0x53   :  { %v607_v44 = vpop.eup %606  ;;  %v325_v22 = vmul.f32 0.36787942, %v605_v57  ;;  %v420_v16 = vmul.f32 -0.5, %v418_v20  ;;  %v404_v30 = vmul.f32 1.442695, %v401_v11  ;;  %v288_v51 = vadd.f32 %v286_v8, %v268_v15 }
  0x54   :  { %v326_v33 = vmul.f32 0.36787942, %v607_v44  ;;  %v421_v46 = vmul.f32 -0.5, %v419_v42  ;;  %v289_v26 = vadd.f32 %v287_v12, %v269_v40  ;;  %v307_v52 = vmul.f32 %v903_v7, %v305_v56  ;;  %v1050_v12 = vld [vmem:[%s1083_s0 + $0x64] sm:$0xff] }
  0x55   :  { %v609_v48 = vpop.eup %608  ;;  %v308_v53 = vmul.f32 %v909_v37, %v306_v6  ;;  %620 = vpow2.f32 %v402_v25  ;;  %v422_v2 = vmul.f32 1.442695, %v420_v16  ;;  %v437_v31 = vsub.f32 %v1025_v21, %v662_v1  ;;  %v1035_v37 = vld [vmem:[%s1083_s0 + $0x63] sm:$0xff] }
  0x56   :  { %v611_v45 = vpop.eup %610  ;;  %v438_v49 = vmul.f32 %v436_v43, %v436_v43  ;;  %v331_v38 = vadd.f32 %v325_v22, %v311_v41  ;;  %v332_v62 = vadd.f32 %v326_v33, %v312_v27  ;;  %v345_v32 = vmul.f32 0.60653067, %v609_v48  ;;  %v1055_v41 = vld [vmem:[%s1083_s0 + $0x6c] sm:$0xff] }
  0x57   :  { %v613_v61 = vpop.eup %612  ;;  %v346_v63 = vmul.f32 0.60653067, %v611_v45  ;;  %622 = vpow2.f32 %v404_v30  ;;  %v424_v9 = vmul.f32 1.442695, %v421_v46  ;;  %v309_v13 = vadd.f32 %v307_v52, %v288_v51 }
  0x58   :  { %v615_v34 = vpop.eup %614  ;;  %v310_v54 = vadd.f32 %v308_v53, %v289_v26  ;;  %v327_v7 = vmul.f32 %v921_v60, %v325_v22  ;;  %v328_v59 = vmul.f32 %v926_v17, %v326_v33  ;;  %624 = vpow2.f32 %v422_v2  ;;  %v1044_v17 = vld [vmem:[%s1083_s0 + $0x6b] sm:$0xff] }
  0x59   :  { %v439_v56 = vmul.f32 %v437_v31, %v437_v31  ;;  %v440_v5 = vmul.f32 -0.5, %v438_v49  ;;  %v351_v18 = vadd.f32 %v345_v32, %v331_v38  ;;  %v352_v19 = vadd.f32 %v346_v63, %v332_v62 }
  0x5a   :  { %v365_v23 = vmul.f32 0.36787942, %v613_v61  ;;  %v366_v15 = vmul.f32 0.36787942, %v615_v34  ;;  %626 = vpow2.f32 %v424_v9  ;;  %v456_v39 = vsub.f32 %v1035_v37, %v657_v0 }
  0x5b   :  { %v617_v10 = vpop.eup %616  ;;  %v329_v8 = vadd.f32 %v327_v7, %v309_v13  ;;  %v347_v6 = vmul.f32 %v940_v4, %v345_v32  ;;  %v330_v11 = vadd.f32 %v328_v59, %v310_v54  ;;  %v348_v35 = vmul.f32 %v946_v50, %v346_v63 }
  0x5c   :  { %v619_v60 = vpop.eup %618  ;;  %v441_v40 = vmul.f32 -0.5, %v439_v56  ;;  %v371_v4 = vadd.f32 %v365_v23, %v351_v18  ;;  %v372_v20 = vadd.f32 %v366_v15, %v352_v19  ;;  %v385_v57 = vmul.f32 0.082085006, %v617_v10 }
  0x5d   :  { %v442_v25 = vmul.f32 1.442695, %v440_v5  ;;  %v386_v43 = vmul.f32 0.082085006, %v619_v60  ;;  %v457_v50 = vsub.f32 %v1044_v17, %v662_v1  ;;  %v458_v27 = vmul.f32 %v456_v39, %v456_v39 }
  0x5e   :  { %v444_v44 = vmul.f32 1.442695, %v441_v40  ;;  %v349_v22 = vadd.f32 %v347_v6, %v329_v8  ;;  %v476_v16 = vsub.f32 %v1050_v12, %v657_v0  ;;  %v477_v33 = vsub.f32 %v1055_v41, %v662_v1 }
  0x5f   :  { %v621_v42 = vpop.eup %620  ;;  %628 = vpow2.f32 %v442_v25  ;;  %v367_v46 = vmul.f32 %v954_v58, %v365_v23  ;;  %v459_v48 = vmul.f32 %v457_v50, %v457_v50  ;;  %v460_v51 = vmul.f32 -0.5, %v458_v27 }
  0x60   :  { %630 = vpow2.f32 %v444_v44  ;;  %v350_v26 = vadd.f32 %v348_v35, %v330_v11  ;;  %v368_v52 = vmul.f32 %v961_v24, %v366_v15  ;;  %v478_v53 = vmul.f32 %v476_v16, %v476_v16 }
  0x61   :  { %v623_v30 = vpop.eup %622  ;;  %v479_v45 = vmul.f32 %v477_v33, %v477_v33  ;;  %v391_v31 = vadd.f32 %v385_v57, %v371_v4  ;;  %v392_v49 = vadd.f32 %v386_v43, %v372_v20  ;;  %v406_v61 = vmul.f32 0.01831564, %v621_v42 }
  0x62   :  { %v625_v2 = vpop.eup %624  ;;  %v461_v38 = vmul.f32 -0.5, %v459_v48  ;;  %v407_v0 = vmul.f32 0.01831564, %v623_v30  ;;  %v462_v62 = vmul.f32 1.442695, %v460_v51  ;;  %v480_v32 = vmul.f32 -0.5, %v478_v53 }
  0x63   :  { %v481_v1 = vmul.f32 -0.5, %v479_v45  ;;  %v369_v34 = vadd.f32 %v367_v46, %v349_v22  ;;  %v387_v58 = vmul.f32 %v968_v28, %v385_v57  ;;  %v370_v13 = vadd.f32 %v368_v52, %v350_v26 }
  0x64   :  { %v627_v63 = vpop.eup %626  ;;  %v464_v9 = vmul.f32 1.442695, %v461_v38  ;;  %632 = vpow2.f32 %v462_v62  ;;  %v482_v54 = vmul.f32 1.442695, %v480_v32  ;;  %v388_v7 = vmul.f32 %v973_v29, %v386_v43 }
  0x65   :  { %v484_v24 = vmul.f32 1.442695, %v481_v1  ;;  %v412_v59 = vadd.f32 %v406_v61, %v391_v31  ;;  %v426_v56 = vmul.f32 0.082085006, %v625_v2  ;;  %v413_v5 = vadd.f32 %v407_v0, %v392_v49 }
  0x66   :  { %634 = vpow2.f32 %v464_v9  ;;  %v427_v18 = vmul.f32 0.082085006, %v627_v63  ;;  %v389_v23 = vadd.f32 %v387_v58, %v369_v34  ;;  %v408_v15 = vmul.f32 %v980_v36, %v406_v61 }
  0x67   :  { %636 = vpow2.f32 %v482_v54  ;;  %v390_v28 = vadd.f32 %v388_v7, %v370_v13  ;;  %v409_v39 = vmul.f32 %v991_v47, %v407_v0  ;;  %v432_v60 = vadd.f32 %v426_v56, %v412_v59 }
  0x68   :  { %638 = vpow2.f32 %v484_v24  ;;  %v433_v6 = vadd.f32 %v427_v18, %v413_v5  ;;  %v410_v29 = vadd.f32 %v408_v15, %v389_v23  ;;  %v428_v35 = vmul.f32 %v1000_v3, %v426_v56 }
  0x69   :  { %v629_v19 = vpop.eup %628  ;;  %v411_v40 = vadd.f32 %v409_v39, %v390_v28  ;;  %v429_v4 = vmul.f32 %v1006_v55, %v427_v18 }
  0x6a   :  { %v631_v10 = vpop.eup %630  ;;  %v446_v8 = vmul.f32 0.13533528, %v629_v19  ;;  %v430_v44 = vadd.f32 %v428_v35, %v410_v29 }
  0x6b   :  { %v447_v11 = vmul.f32 0.13533528, %v631_v10  ;;  %v431_v22 = vadd.f32 %v429_v4, %v411_v40 }
  0x6c   :  { %v452_v20 = vadd.f32 %v446_v8, %v432_v60  ;;  %v448_v50 = vmul.f32 %v1013_v14, %v446_v8 }
  0x6d   :  { %v453_v25 = vadd.f32 %v447_v11, %v433_v6  ;;  %v449_v16 = vmul.f32 %v1025_v21, %v447_v11 }
  0x6e   :  { %v633_v57 = vpop.eup %632  ;;  %v450_v55 = vadd.f32 %v448_v50, %v430_v44 }
  0x6f   :  { %v466_v43 = vmul.f32 0.082085006, %v633_v57  ;;  %v451_v52 = vadd.f32 %v449_v16, %v431_v22 }
  0x70   :  { %v635_v42 = vpop.eup %634 }
  0x71   :  { %v637_v36 = vpop.eup %636  ;;  %v467_v47 = vmul.f32 0.082085006, %v635_v42  ;;  %v472_v33 = vadd.f32 %v466_v43, %v452_v20  ;;  %v468_v51 = vmul.f32 %v1035_v37, %v466_v43 }
  0x72   :  { %v639_v27 = vpop.eup %638  ;;  %v486_v30 = vmul.f32 0.01831564, %v637_v36 }
  0x73   :  { %v473_v3 = vadd.f32 %v467_v47, %v453_v25  ;;  %v487_v46 = vmul.f32 0.01831564, %v639_v27  ;;  %v469_v53 = vmul.f32 %v1044_v17, %v467_v47  ;;  %v470_v14 = vadd.f32 %v468_v51, %v450_v55 }
  0x74   :  { %v492_v48 = vadd.f32 %v486_v30, %v472_v33  ;;  %v488_v45 = vmul.f32 %v1050_v12, %v486_v30 }
  0x75   :  { %v493_v26 = vadd.f32 %v487_v46, %v473_v3  ;;  %v471_v2 = vadd.f32 %v469_v53, %v451_v52  ;;  %v489_v21 = vmul.f32 %v1055_v41, %v487_v46 }
  0x76   :  { %640 = vrcp.f32 %v492_v48  ;;  %v490_v31 = vadd.f32 %v488_v45, %v470_v14 }
  0x77   :  { %642 = vrcp.f32 %v493_v26  ;;  %v491_v49 = vadd.f32 %v489_v21, %v471_v2 }
  0x80   :  { %v641_v61 = vpop.eup %640 }
  0x81   :  { %v643_v38 = vpop.eup %642  ;;  %v495_v0 = vmul.f32 %v641_v61, %v490_v31 }
  0x82   :  { %v497_v62 = vmul.f32 %v643_v38, %v491_v49 }
  0x83   :  { %498 = vst [vmem:[%s1084_s1] sm:$0xff] %v495_v0 }
  0x84   :  { %499 = vst [vmem:[%s1084_s1 + $0x8] sm:$0xff] %v497_v62 }

</bundles_post_ra>
